<compile_context>
chip_gen: v7x
topology: tpu7x:2x2x1
jax: 0.10.0
libtpu: 0.0.40
codegen_flags: <defaults>
</compile_context>

<pallas_src>
import functools

import jax
import jax.numpy as jnp
from jax import lax
from jax.experimental import pallas as pl
from jax.experimental.pallas import tpu as pltpu

_LANE = 128


def _round_up(a, b):
    return (a + b - 1) // b * b


def _maxpool_same_kernel(x_ref, o_ref, *, kernel_size):
    # x_ref: (K, C, TL) -- tap k holds padded_input[..., j*K + k] for this L tile
    # o_ref: (C, TL)
    m = x_ref[0]
    for k in range(1, kernel_size):          # K is small; unrolled VPU max chain
        m = jnp.maximum(m, x_ref[k])
    o_ref[...] = m


def maxpool1d_pad_same(x, kernel_size):
    """SAME-padded max pool matching MyMaxPool1dPadSame.forward.

    x: (N, C, L) float32
    returns (N, C, ceil(L / kernel_size))   (MaxPool1d default stride == kernel_size)
    """
    N, C, L = x.shape
    K = int(kernel_size)

    # SAME-padding amount exactly as in the PyTorch module (self.stride == 1).
    stride_same = 1
    out_dim = (L + stride_same - 1) // stride_same
    p = max(0, (out_dim - 1) * stride_same + K - L)
    pad_left = p // 2
    pad_right = p - pad_left
    L_padded = L + p

    # nn.MaxPool1d(kernel_size=K): stride=K, padding=0, floor mode.
    L_out = (L_padded - K) // K + 1
    L_cov = L_out * K                      # columns of the padded signal the windows cover

    # --- glue: zero pad (constant 0, like F.pad) and keep only the covered columns.
    xp = jnp.pad(x, ((0, 0), (0, 0), (pad_left, pad_right)))[:, :, :L_cov]
    # Disjoint windows -> tap split is a free reshape (no Kx data inflation).
    xt = xp.reshape(N, C, L_out, K)

    # Lane-dense L_out tiling (multiple of 128, <=512), budgeted for VMEM.
    itemsize = x.dtype.itemsize
    budget = 8 * 1024 * 1024               # per-step block budget (double-buffered in+out)
    max_tl = budget // (2 * (K + 1) * C * itemsize)
    max_tl = max(_LANE, (max_tl // _LANE) * _LANE)
    TL = min(512, _round_up(L_out, _LANE), max_tl)
    L_out_p = _round_up(L_out, TL)
    if L_out_p != L_out:
        xt = jnp.pad(xt, ((0, 0), (0, 0), (0, L_out_p - L_out), (0, 0)))

    # Relayout so the kernel sees (K, C, TL) tiles with L_out on lanes, C on sublanes.
    # TODO(synk): fold this tap relayout into the kernel with strided lane loads once
    # lane-strided pl.ds reads are guaranteed to lower; for now it is one XLA transpose.
    xk = jnp.transpose(xt, (0, 3, 1, 2))   # (N, K, C, L_out_p)

    kernel = functools.partial(_maxpool_same_kernel, kernel_size=K)

    out = pl.pallas_call(
        kernel,
        out_shape=jax.ShapeDtypeStruct((N, C, L_out_p), x.dtype),
        grid_spec=pltpu.PrefetchScalarGridSpec(
            num_scalar_prefetch=0,
            grid=(N, L_out_p // TL),
            in_specs=[
                pl.BlockSpec((None, K, C, TL), lambda n, j: (n, 0, 0, j)),
            ],
            out_specs=pl.BlockSpec((None, C, TL), lambda n, j: (n, 0, j)),
        ),
        compiler_params=pltpu.CompilerParams(
            dimension_semantics=("parallel", "parallel")),
    )(xk)

    return out[:, :, :L_out]


if __name__ == "__main__":
    N, C, L = 2, 4, 16
    key = jax.random.PRNGKey(0)
    x = jax.random.normal(key, (N, C, L), jnp.float32)

    for K in (2, 3, 5):
        out = jax.block_until_ready(maxpool1d_pad_same(x, K))

        # Reference replicating the PyTorch module exactly:
        # zero SAME pad (stride-1 formula), then MaxPool1d(kernel=K, stride=K, floor).
        p = max(0, K - 1)
        xp_ref = jnp.pad(x, ((0, 0), (0, 0), (p // 2, p - p // 2)))
        ref = lax.reduce_window(xp_ref, -jnp.inf, lax.max,
                                (1, 1, K), (1, 1, K), "VALID")

        assert out.shape == ref.shape, (K, out.shape, ref.shape)
        assert jnp.allclose(out, ref, atol=0.0, rtol=0.0), f"mismatch for K={K}"

    print("KERNEL_OK")
</pallas_src>

<mosaic_0001>
module attributes {stable_mosaic.version = 11 : i64} {
  func.func @_maxpool_same_kernel(%arg0: i32, %arg1: i32, %arg2: memref<1x2x4x128xf32, #tpu.memory_space<vmem>>, %arg3: memref<1x4x128xf32, #tpu.memory_space<vmem>>) attributes {dimension_semantics = [#tpu.dimension_semantics<parallel>, #tpu.dimension_semantics<parallel>], iteration_bounds = array<i64: 2, 1>, scalar_prefetch = 0 : i64, scratch_operands = 0 : i64, tpu.core_type = #tpu.core_type<tc>, window_params = [{transform_indices = @transform_0, window_bounds = array<i64: 1, 2, 4, 128>}, {transform_indices = @transform_1, window_bounds = array<i64: 1, 4, 128>}]} {
    %c0 = arith.constant 0 : index
    %c0_0 = arith.constant 0 : index
    %c0_1 = arith.constant 0 : index
    %c0_2 = arith.constant 0 : index
    %0 = vector.load %arg2[%c0, %c0_0, %c0_1, %c0_2] : memref<1x2x4x128xf32, #tpu.memory_space<vmem>>, vector<1x1x4x128xf32>
    %1 = vector.shape_cast %0 : vector<1x1x4x128xf32> to vector<4x128xf32>
    %c0_3 = arith.constant 0 : index
    %c1 = arith.constant 1 : index
    %c0_4 = arith.constant 0 : index
    %c0_5 = arith.constant 0 : index
    %2 = vector.load %arg2[%c0_3, %c1, %c0_4, %c0_5] : memref<1x2x4x128xf32, #tpu.memory_space<vmem>>, vector<1x1x4x128xf32>
    %3 = vector.shape_cast %2 : vector<1x1x4x128xf32> to vector<4x128xf32>
    %4 = arith.maximumf %1, %3 : vector<4x128xf32>
    %c0_6 = arith.constant 0 : index
    %c0_7 = arith.constant 0 : index
    %c0_8 = arith.constant 0 : index
    %5 = vector.load %arg3[%c0_6, %c0_7, %c0_8] : memref<1x4x128xf32, #tpu.memory_space<vmem>>, vector<1x4x128xf32>
    %6 = vector.shape_cast %5 : vector<1x4x128xf32> to vector<4x128xf32>
    %7 = vector.shape_cast %4 : vector<4x128xf32> to vector<1x4x128xf32>
    tpu.vector_store %arg3[%c0_6, %c0_7, %c0_8], %7 {strides = array<i32>} : memref<1x4x128xf32, #tpu.memory_space<vmem>>, vector<1x4x128xf32>,
    return
  }
  func.func @transform_0(%arg0: i32, %arg1: i32) -> (i32, i32, i32, i32) {
    %c0_i32 = arith.constant 0 : i32
    %c0_i32_0 = arith.constant 0 : i32
    %c0_i32_1 = arith.constant 0 : i32
    return %arg0, %c0_i32, %c0_i32_0, %arg1 : i32, i32, i32, i32
  }
  func.func @transform_1(%arg0: i32, %arg1: i32) -> (i32, i32, i32) {
    %c0_i32 = arith.constant 0 : i32
    %c0_i32_0 = arith.constant 0 : i32
    return %arg0, %c0_i32, %arg1 : i32, i32, i32
  }
}

</mosaic_0001>

<bundles_post_ra>
// kernel: tpu_custom_call.1
= control target key start
LH: loop header
LB: loop body
LE: loop exit
PB: predicated region body
PF: predicated region fallthrough
CT: control target
= control target key end

     0   :  { %6 = vsyncpa [#allocation3], 0  ;;  %s635_s0 = inlined_call_operand.hbm [shape: f32[2,2,4,128], index: 0, kind: input, shape index: {}]   ;;  %s636_s1 = inlined_call_operand.hbm [shape: f32[2,4,128], index: 1, kind: output, shape index: {}]  }
   0x1   :  { %8 = vsyncpa [#allocation3 + $0x1], 0 }
   0x2   :  { %9 = vsyncpa [#allocation4], 0 }
   0x3   :  { %11 = vsyncpa [#allocation4 + $0x1], 0  ;;  %s461_s6 = smov 0   ;;  %s463_s7 = smov 0  }
   0x4   :  { %s465_s8 = smov 0   ;;  %s467_s9 = smov 0  }
   0x5   :  { %s469_s10 = smov 0   ;;  %s471_s11 = smov 0  }
   0x6 LB: > { %s253_s12 = sadd.s32 4294967295, %s445_s11   ;;  %s254_s13 = sadd.s32 4294967294, %s445_s11   ;;  %s445_s11 = sphi %s471_s11, %s17_s11   ;;  %s441_s10 = sphi %s469_s10, %s651_s10   ;;  %s437_s9 = sphi %s467_s9, %s650_s9   ;;  %s433_s8 = sphi %s465_s8, %s649_s8   ;;  %s429_s7 = sphi %s463_s7, %s648_s7   ;;  %s425_s6 = sphi %s461_s6, %s647_s6  }
   0x7   : > { %s29_s14 = sadd.s32 1, %s441_s10  ;;  %s38_s15 = sadd.s32 1, %s433_s8 }
   0x8   : > { %p31_p0 = scmp.ge.s32.totalorder %s29_s14, 2  ;;  %p45_p1 = scmp.ne.s32.totalorder %s433_s8, %s429_s7 }
   0x9   : > { %p46_p2 = scmp.eq.s32.totalorder %s445_s11, 0  ;;  %p51_p3 = scmp.ne.s32.totalorder %s429_s7, %s425_s6 }
   0xa   : > { %s653_s14 = smov (%p31_p0, %s29_s14), 0  ;;  %p52_p5 = scmp.eq.s32.totalorder %s253_s12, 0 }
   0xb   : > { %p502_p4 = por %p46_p2, %p45_p1  ;;  %s33_s17 = ssub.s32 %s441_s10, %s653_s14 }
   0xc   : > { %p77_p6 = scmp.eq.s32.totalorder %s253_s12, 1  ;;  %p36_p7 = scmp.eq.s32.totalorder %s33_s17, 0 }
   0xd   : > { %p508_p8 = por %p52_p5, %p51_p3  ;;  %p83_p10 = scmp.eq.s32.totalorder %s254_s13, 1 }
   0xe   : > { %p512_p9 = por %p77_p6, %p45_p1  ;;  %p281_p13 = scmp.lt.s32.totalorder %s445_s11, 2 }
   0xf   : > { %s517_s20 = scalar_select %p36_p7, %s433_s8, %s38_s15  }
  0x10   : > { %s640_s19 = scalar_select %p512_p9, 1, 0 }
  0x11   : > { %p519_p11 = por %p83_p10, %p51_p3  ;;  %s103_s22 = sand.u32 1, %s433_s8  }
  0x12   : > { %s257_s23 = sshll.u32 %s103_s22, 3  ;;  %s268_s24 = sshll.u32 %s441_s10, 7 }
  0x13   : > { %s641_s21 = scalar_select %p519_p11, 1, 0 }
  0x14   : > { %s530_s27 = scalar_lea.hbm %s635_s0, %s268_s24  ;;  %s107_s28 = scalar_lea.vmem [#allocation2], %s257_s23 }
  0x15   : > { %s115_s29 = sshll.u32 %s107_s28, 4  ;;  %p536_p0 = pnand %p281_p13, %p502_p4  ;;  %s532_s29 = int_to_ptr.vmem [resolvable:$true] %s115_s29 }
  0x16   : > { %s541_s2 = scalar_lea.sflag [#allocation3], %s103_s22  ;;  %s333_s3 = scalar_lea.hbm %s530_s27, 128 }
  0x17   : > { %p334_p2 = scmp.ne.s32.totalorder %s530_s27, %s333_s3  ;;  %p335_p3 = pneg %p536_p0 }
  0x18   : > { %s338_s12 = scalar_lea.hbm %s635_s0, 256  ;;  %p339_p4 = scmp.lt.u32.totalorder %s530_s27, %s635_s0 }
  0x19   : > { %p336_p5 = pnand %p335_p3, %p334_p2  ;;  %p340_p7 = scmp.lt.u32.totalorder %s338_s12, %s333_s3 }
  0x1a   : > { %p342_p13 = scmp.lt.u32.totalorder %s333_s3, %s530_s27 }
  0x1b   : > { %p337_p6 = pneg %p336_p5  ;;  %p341_p10 = por %p340_p7, %p339_p4 }
  0x1d   : > { %p343_p12 = por %p342_p13, %p341_p10 }
  0x1f   : > { %p344_p1 = pnand %p343_p12, %p337_p6 }
  0x21   : > { %347 = shalt.err (!%p344_p1)
}
  0x22   : > { %s348_s16 = scalar_lea.vmem %s532_s29, 128  ;;  %s447_s17 = smov [#allocation2]  }
  0x23   : > { %p349_p2 = scmp.ne.s32.totalorder %s532_s29, %s348_s16  ;;  %s353_s22 = sshll.u32 %s447_s17, 4  ;;  %s354_s22 = int_to_ptr.vmem [resolvable:$false] %s353_s22 }
  0x24   : > { %s355_s23 = scalar_lea.vmem %s354_s22, 256  ;;  %p356_p9 = scmp.lt.s32.totalorder %s532_s29, %s354_s22 }
  0x25   : > { %p351_p5 = pnand %p349_p2, %p335_p3  ;;  %p357_p4 = scmp.lt.s32.totalorder %s355_s23, %s348_s16 }
  0x27   : > { %p352_p11 = pneg %p351_p5  ;;  %p358_p7 = por %p357_p4, %p356_p9 }
  0x29   : > { %p359_p10 = pnand %p358_p7, %p352_p11 }
  0x2b   : > { %362 = shalt.err (!%p359_p10)
}
  0x2c   : > { %s448_s24 = smov 64   ;;  %s449_s25 = smov 4  }
  0x2d   : > { %276 = dma.hbm_to_vmem [thread:$0]  (!%p536_p0), %s530_s27, 128, %s532_s29, %s541_s2, %s448_s24, %s448_s24, %s449_s25  }
  0x2e   : > { %p123_p12 = scmp.lt.s32.totalorder %s445_s11, 3  ;;  %p643_p1 = scmp.ge.s32.totalorder %s445_s11, 1 }
  0x30   : > { %p124_p3 = pnand %p643_p1, %p123_p12 }
  0x31   : > { %s573_s26 = sand.u32 (!%p124_p3), 1, %s429_s7  }
  0x32   : > { %127 = sbr.rel (%p124_p3) target bundleno = 84 (0x54), region = 24  ;;  %s261_s28 = sshll.u32 (!%p124_p3), %s573_s26, 3 }
  0x33   : > { %s130_s3 = scalar_lea.sflag (!%p124_p3), [#allocation3], %s573_s26  ;;  %s133_s4 = scalar_lea.vmem (!%p124_p3), [#allocation2], %s261_s28 }
  0x39   : > { %416 = dma.done.wait (%p508_p8), %s130_s3, 128  }
  0x3a   : > { %418 = vsyncadd (%p508_p8), %s130_s3, 4294967168  ;;  %s262_s27 = sshll.u32 %s573_s26, 2  ;;  %s265_s2 = sshll.u32 %s437_s9, 6  ;;  %v152_v0 = vld [vmem:[%s133_s4] sm:$0xf] }
  0x3b   : > { %s151_s29 = scalar_lea.vmem [#allocation5], %s262_s27  ;;  %v263_v1 = vld [vmem:[%s133_s4 + $0x4] sm:$0xf]  ;;  %s588_s18 = scalar_lea.hbm %s636_s1, %s265_s2 }
  0x3c   : > { %s172_s30 = sshll.u32 %s151_s29, 4  ;;  %v155_v2 = vmax.f32 %v152_v0, %v263_v1  ;;  %s158_s13 = scalar_lea.sflag [#allocation4], %s573_s26  ;;  %s583_s30 = int_to_ptr.vmem [resolvable:$true] %s172_s30 }
  0x3d   : > { %s363_s15 = scalar_lea.vmem %s583_s30, 64  ;;  %p644_p9 = scmp.ne.s32.totalorder %s640_s19, 0 }
  0x3e   : > { %156 = vst [vmem:[%s151_s29] sm:$0xf] %v155_v2  ;;  %p364_p8 = scmp.ne.s32.totalorder %s583_s30, %s363_s15  ;;  %s450_s9 = smov [#allocation5]  }
  0x3f   : > { %s367_s16 = sshll.u32 %s450_s9, 4  ;;  %s368_s16 = int_to_ptr.vmem [resolvable:$false] %s367_s16 }
  0x40   : > { %p365_p11 = pnand %p364_p8, %p644_p9  ;;  %s369_s17 = scalar_lea.vmem %s368_s16, 128 }
  0x41   : > { %p370_p6 = scmp.lt.s32.totalorder %s583_s30, %s368_s16  ;;  %p371_p13 = scmp.lt.s32.totalorder %s369_s17, %s363_s15 }
  0x42   : > { %p366_p0 = pneg %p365_p11 }
  0x43   : > { %p372_p2 = por %p371_p13, %p370_p6 }
  0x45   : > { %p373_p5 = pnand %p372_p2, %p366_p0 }
  0x47   : > { %376 = shalt.err (!%p373_p5)
}
  0x48   : > { %s377_s22 = scalar_lea.hbm %s588_s18, 64  ;;  %s381_s25 = scalar_lea.hbm %s636_s1, 128 }
  0x49   : > { %p378_p4 = scmp.ne.s32.totalorder %s588_s18, %s377_s22  ;;  %p382_p12 = scmp.lt.u32.totalorder %s588_s18, %s636_s1 }
  0x4a   : > { %p383_p1 = scmp.lt.u32.totalorder %s381_s25, %s377_s22  ;;  %p385_p8 = scmp.lt.u32.totalorder %s377_s22, %s588_s18 }
  0x4b   : > { %p379_p7 = pnand %p378_p4, %p644_p9 }
  0x4c   : > { %p384_p3 = por %p383_p1, %p382_p12 }
  0x4d   : > { %p380_p10 = pneg %p379_p7 }
  0x4e   : > { %p386_p11 = por %p385_p8, %p384_p3 }
  0x50   : > { %p387_p0 = pnand %p386_p11, %p380_p10 }
  0x52   : > { %390 = shalt.err (!%p387_p0)
}
  0x53   : > { %271 = dma.vmem_to_hbm [thread:$0]  (%p644_p9), %s583_s30, 64, %s588_s18, %s158_s13  }
  0x54 PF: > { %s184_s3 = sand.u32 1, %s425_s6   ;;  %p645_p6 = scmp.ne.s32.totalorder %s641_s21, 0 }
  0x55   : > { %p646_p13 = scmp.ge.s32.totalorder %s445_s11, 2  ;;  %s185_s4 = scalar_lea.sflag [#allocation4], %s184_s3 }
  0x57   : > { %p278_p2 = pnand %p646_p13, %p645_p6 }
  0x59   : > { %420 = dma.done.wait (!%p278_p2), %s185_s4, 64  }
  0x5a   : > { %422 = vsyncadd (!%p278_p2), %s185_s4, 4294967232  ;;  %s17_s11 = sadd.s32 1, %s445_s11   ;;  %s647_s6 = smov %s429_s7 }
  0x5b   : > { %p14_p5 = scmp.ge.s32.totalorder %s17_s11, 4   ;;  %s648_s7 = smov %s433_s8 }
  0x5c   : > { %s649_s8 = smov %s517_s20  ;;  %s650_s9 = smov %s441_s10 }
  0x5d   : > { %s651_s10 = smov %s653_s14  ;;  %16 = sbr.rel (!%p14_p5) target bundleno = 6 (0x6), region = 70 }
  0x64   :  { %190 = vsyncpa [#allocation3], 1 }
  0x65   :  { %192 = vsyncpa [#allocation3 + $0x1], 1 }
  0x66   :  { %193 = vsyncpa [#allocation4], 1 }
  0x67   :  { %195 = vsyncpa [#allocation4 + $0x1], 1 }

</bundles_post_ra>
